<compile_context>
chip_gen: v5e
topology: v5e:2x2
jax: 0.10.0
libtpu: 0.0.40
codegen_flags: <defaults>
</compile_context>

<pallas_src>
import functools

import jax
import jax.numpy as jnp
from jax.experimental import pallas as pl
from jax.experimental.pallas import tpu as pltpu


def _patch_embed_kernel(x_ref, w_ref, b_ref, o_ref):
    # x_ref: (C, hb, P, W)  one batch element, hb patch-rows, full width (f32)
    # w_ref: (P, C*P, E)    bf16 packed weight, K-order (p2, c, p1)  (resident)
    # b_ref: (1, E)         f32 bias
    # o_ref: (hb, w, E)     embeddings of the hb*w patches handled this step
    C, hb, P, W = x_ref.shape
    wp = W // P                       # patches along the width
    E = w_ref.shape[-1]

    bias = b_ref[...]                 # (1, E) f32
    x_all = x_ref[...]                # load the whole block once

    for hj in range(hb):              # static unroll over patch rows in block
        a = x_all[:, hj]              # (C, P, W)
        # ---- in-VMEM patch relayout (tile-aligned ops only) ------------
        a = a.reshape(C * P, W)       # merge leading dims (P % 8 == 0 -> no-op)
        a = a.T                       # (W, C*P): bring the width/p2 axis to rows
        a = a.reshape(wp, P, C * P)   # split W -> (wi, p2): [wi, p2, c*P+p1]
        a = a.astype(jnp.bfloat16)    # bf16 feed for the MXU
        # ---- GEMM: sum over p2 of (w, C*P) @ (C*P, E), f32 accumulate --
        acc = jnp.zeros((wp, E), jnp.float32)
        for p2 in range(P):           # static unroll, P MXU pushes
            acc = acc + jnp.dot(a[:, p2, :], w_ref[p2],
                                preferred_element_type=jnp.float32)
        # f32 epilogue (bias add) then cast to the output dtype.
        o_ref[hj] = (acc + bias).astype(o_ref.dtype)


def prepare_patch_weight(weight, *, patch_size, in_channels,
                         dtype=jnp.bfloat16):
    """One-time re-pack of the nn.Linear weight (E, P*P*C) -> (P, C*P, E).

    K-order becomes (p2, c, p1), matching the layout the kernel's in-VMEM
    relayout produces.  Done once at init, not per forward pass.
    """
    E, K = weight.shape
    P, C = patch_size, in_channels
    assert K == P * P * C
    w4 = weight.reshape(E, P, P, C)           # (e, p1, p2, c)
    w4 = jnp.transpose(w4, (2, 3, 1, 0))      # (p2, c, p1, e)
    return w4.reshape(P, C * P, E).astype(dtype)


@functools.partial(jax.jit,
                   static_argnames=("patch_size", "patch_rows_per_block"))
def patch_embedding(x, w_packed, bias, *, patch_size,
                    patch_rows_per_block=1):
    """x: (B, C, H, W) NCHW.  w_packed: (P, C*P, E) from prepare_patch_weight.
    bias: (E,).  Returns (B, num_patches, E)."""
    B, C, H, W = x.shape
    P = patch_size
    h, w = H // P, W // P
    Pw, CP, E = w_packed.shape
    assert Pw == P and CP == C * P
    hb = patch_rows_per_block
    assert h % hb == 0

    # Free, metadata-only dim split (no HBM data movement).
    x5 = x.reshape(B, C, h, P, W)
    b2 = bias.reshape(1, E).astype(jnp.float32)

    grid = (B, h // hb)
    flops = 2 * B * h * w * (P * P * C) * E
    bytes_accessed = (x.size * x.dtype.itemsize
                      + w_packed.size * w_packed.dtype.itemsize
                      + b2.size * 4
                      + B * h * w * E * x.dtype.itemsize)

    out = pl.pallas_call(
        _patch_embed_kernel,
        out_shape=jax.ShapeDtypeStruct((B, h, w, E), x.dtype),
        grid_spec=pltpu.PrefetchScalarGridSpec(
            num_scalar_prefetch=0,
            grid=grid,
            in_specs=[
                # one batch element, hb patch rows, all channels, full width
                pl.BlockSpec((None, C, hb, P, W),
                             lambda b, i: (b, 0, i, 0, 0)),
                # weight & bias: constant index -> DMA'd once, kept resident
                pl.BlockSpec((P, CP, E), lambda b, i: (0, 0, 0)),
                pl.BlockSpec((1, E), lambda b, i: (0, 0)),
            ],
            out_specs=pl.BlockSpec((None, hb, w, E),
                                   lambda b, i: (b, i, 0, 0)),
        ),
        compiler_params=pltpu.CompilerParams(
            dimension_semantics=("parallel", "parallel")),
        cost_estimate=pl.CostEstimate(flops=flops, transcendentals=0,
                                      bytes_accessed=bytes_accessed),
    )(x5, w_packed, b2)

    # Free reshape: (B, h, w, E) -> (B, h*w, E); n = hi*w + wi as in einops.
    return out.reshape(B, h * w, E)


if __name__ == "__main__":
    # Module defaults: in_channels=3, patch_size=8, emb_size=128.
    B, C, H, W = 2, 3, 16, 16
    patch_size = 8
    emb_size = 128
    K = patch_size * patch_size * C

    key = jax.random.PRNGKey(0)
    kx, kw, kb = jax.random.split(key, 3)
    x = jax.random.normal(kx, (B, C, H, W), dtype=jnp.float32)

    # Deterministic nn.Linear-style init: U(-1/sqrt(K), 1/sqrt(K)).
    bound = 1.0 / (K ** 0.5)
    weight = jax.random.uniform(kw, (emb_size, K), jnp.float32, -bound, bound)
    bias = jax.random.uniform(kb, (emb_size,), jnp.float32, -bound, bound)

    # One-time weight re-pack (would live in module __init__).
    w_packed = prepare_patch_weight(weight, patch_size=patch_size,
                                    in_channels=C)

    out1 = patch_embedding(x, w_packed, bias, patch_size=patch_size,
                           patch_rows_per_block=1)
    out2 = patch_embedding(x, w_packed, bias, patch_size=patch_size,
                           patch_rows_per_block=2)
    out1, out2 = jax.block_until_ready((out1, out2))

    # ---- Pure-JAX reference: einops rearrange + Linear -----------------
    def rearrange_ref(xx, P):
        b_, c_, h_, w_ = xx.shape
        hh, ww = h_ // P, w_ // P
        xr = xx.reshape(b_, c_, hh, P, ww, P)
        xr = jnp.transpose(xr, (0, 2, 4, 3, 5, 1))    # (B, h, w, p1, p2, c)
        return xr.reshape(b_, hh * ww, P * P * c_)

    patches = rearrange_ref(x, patch_size)
    # bf16-emulated reference (kernel feeds the MXU bf16, accumulates f32).
    pb = patches.astype(jnp.bfloat16).astype(jnp.float32)
    wb = weight.astype(jnp.bfloat16).astype(jnp.float32)
    ref_bf16 = jnp.einsum("bnk,ek->bne", pb, wb,
                          precision=jax.lax.Precision.HIGHEST) + bias
    ref_f32 = jnp.einsum("bnk,ek->bne", patches, weight,
                         precision=jax.lax.Precision.HIGHEST) + bias

    n_patches = (H // patch_size) * (W // patch_size)
    assert out1.shape == (B, n_patches, emb_size)
    assert jnp.allclose(out1, out2, atol=1e-6, rtol=1e-6)
    assert jnp.allclose(out1, ref_bf16, atol=1e-3, rtol=1e-3)
    assert jnp.allclose(out1, ref_f32, atol=5e-2, rtol=5e-2)

    print("KERNEL_OK")
</pallas_src>

<mosaic_0001>
module attributes {stable_mosaic.version = 11 : i64} {
  func.func @_patch_embed_kernel(%arg0: i32, %arg1: i32, %arg2: memref<1x3x1x8x16xf32, #tpu.memory_space<vmem>>, %arg3: memref<8x24x128xbf16, #tpu.memory_space<vmem>>, %arg4: memref<1x128xf32, #tpu.memory_space<vmem>>, %arg5: memref<1x1x2x128xf32, #tpu.memory_space<vmem>>) attributes {dimension_semantics = [#tpu.dimension_semantics<parallel>, #tpu.dimension_semantics<parallel>], iteration_bounds = array<i64: 2, 2>, scalar_prefetch = 0 : i64, scratch_operands = 0 : i64, tpu.core_type = #tpu.core_type<tc>, window_params = [{transform_indices = @transform_0, window_bounds = array<i64: 1, 3, 1, 8, 16>}, {pipeline_mode = #tpu.pipeline_mode<synchronous>, transform_indices = @transform_1, window_bounds = array<i64: 8, 24, 128>}, {pipeline_mode = #tpu.pipeline_mode<synchronous>, transform_indices = @transform_2, window_bounds = array<i64: 1, 128>}, {transform_indices = @transform_3, window_bounds = array<i64: 1, 1, 2, 128>}]} {
    %c0 = arith.constant 0 : index
    %c0_0 = arith.constant 0 : index
    %0 = vector.load %arg4[%c0, %c0_0] : memref<1x128xf32, #tpu.memory_space<vmem>>, vector<1x128xf32>
    %c0_1 = arith.constant 0 : index
    %c0_2 = arith.constant 0 : index
    %c0_3 = arith.constant 0 : index
    %c0_4 = arith.constant 0 : index
    %c0_5 = arith.constant 0 : index
    %1 = vector.load %arg2[%c0_1, %c0_2, %c0_3, %c0_4, %c0_5] : memref<1x3x1x8x16xf32, #tpu.memory_space<vmem>>, vector<1x3x1x8x16xf32>
    %2 = vector.shape_cast %1 : vector<1x3x1x8x16xf32> to vector<3x1x8x16xf32>
    %3 = vector.shape_cast %2 : vector<3x1x8x16xf32> to vector<3x8x16xf32>
    %4 = vector.shape_cast %3 : vector<3x8x16xf32> to vector<24x16xf32>
    %5 = tpu.transpose %4, [1, 0] : vector<24x16xf32> -> vector<16x24xf32>
    %6 = vector.shape_cast %5 : vector<16x24xf32> to vector<2x8x24xf32>
    %7 = arith.truncf %6 : vector<2x8x24xf32> to vector<2x8x24xbf16>
    %cst = arith.constant 0.000000e+00 : f32
    %8 = vector.broadcast %cst : f32 to vector<2x128xf32>
    %9 = vector.extract_strided_slice %7 {offsets = [0, 0, 0], sizes = [2, 1, 24], strides = [1, 1, 1]} : vector<2x8x24xbf16> to vector<2x1x24xbf16>
    %10 = vector.shape_cast %9 : vector<2x1x24xbf16> to vector<2x24xbf16>
    %c0_6 = arith.constant 0 : index
    %c0_7 = arith.constant 0 : index
    %c0_8 = arith.constant 0 : index
    %11 = vector.load %arg3[%c0_6, %c0_7, %c0_8] : memref<8x24x128xbf16, #tpu.memory_space<vmem>>, vector<1x24x128xbf16>
    %12 = vector.shape_cast %11 : vector<1x24x128xbf16> to vector<24x128xbf16>
    %cst_9 = arith.constant dense<0.000000e+00> : vector<2x128xf32>
    %13 = tpu.matmul %10, %12, %cst_9 {dimension_numbers = #tpu.dot_dimension_numbers<[1], [0], [0], [1], [0, 0, 1, 1], [], []>} : vector<2x24xbf16>, vector<24x128xbf16>, vector<2x128xf32> -> vector<2x128xf32>
    %14 = arith.addf %8, %13 : vector<2x128xf32>
    %15 = vector.extract_strided_slice %7 {offsets = [0, 1, 0], sizes = [2, 1, 24], strides = [1, 1, 1]} : vector<2x8x24xbf16> to vector<2x1x24xbf16>
    %16 = vector.shape_cast %15 : vector<2x1x24xbf16> to vector<2x24xbf16>
    %c1 = arith.constant 1 : index
    %c0_10 = arith.constant 0 : index
    %c0_11 = arith.constant 0 : index
    %17 = vector.load %arg3[%c1, %c0_10, %c0_11] : memref<8x24x128xbf16, #tpu.memory_space<vmem>>, vector<1x24x128xbf16>
    %18 = vector.shape_cast %17 : vector<1x24x128xbf16> to vector<24x128xbf16>
    %cst_12 = arith.constant dense<0.000000e+00> : vector<2x128xf32>
    %19 = tpu.matmul %16, %18, %cst_12 {dimension_numbers = #tpu.dot_dimension_numbers<[1], [0], [0], [1], [0, 0, 1, 1], [], []>} : vector<2x24xbf16>, vector<24x128xbf16>, vector<2x128xf32> -> vector<2x128xf32>
    %20 = arith.addf %14, %19 : vector<2x128xf32>
    %21 = vector.extract_strided_slice %7 {offsets = [0, 2, 0], sizes = [2, 1, 24], strides = [1, 1, 1]} : vector<2x8x24xbf16> to vector<2x1x24xbf16>
    %22 = vector.shape_cast %21 : vector<2x1x24xbf16> to vector<2x24xbf16>
    %c2 = arith.constant 2 : index
    %c0_13 = arith.constant 0 : index
    %c0_14 = arith.constant 0 : index
    %23 = vector.load %arg3[%c2, %c0_13, %c0_14] : memref<8x24x128xbf16, #tpu.memory_space<vmem>>, vector<1x24x128xbf16>
    %24 = vector.shape_cast %23 : vector<1x24x128xbf16> to vector<24x128xbf16>
    %cst_15 = arith.constant dense<0.000000e+00> : vector<2x128xf32>
    %25 = tpu.matmul %22, %24, %cst_15 {dimension_numbers = #tpu.dot_dimension_numbers<[1], [0], [0], [1], [0, 0, 1, 1], [], []>} : vector<2x24xbf16>, vector<24x128xbf16>, vector<2x128xf32> -> vector<2x128xf32>
    %26 = arith.addf %20, %25 : vector<2x128xf32>
    %27 = vector.extract_strided_slice %7 {offsets = [0, 3, 0], sizes = [2, 1, 24], strides = [1, 1, 1]} : vector<2x8x24xbf16> to vector<2x1x24xbf16>
    %28 = vector.shape_cast %27 : vector<2x1x24xbf16> to vector<2x24xbf16>
    %c3 = arith.constant 3 : index
    %c0_16 = arith.constant 0 : index
    %c0_17 = arith.constant 0 : index
    %29 = vector.load %arg3[%c3, %c0_16, %c0_17] : memref<8x24x128xbf16, #tpu.memory_space<vmem>>, vector<1x24x128xbf16>
    %30 = vector.shape_cast %29 : vector<1x24x128xbf16> to vector<24x128xbf16>
    %cst_18 = arith.constant dense<0.000000e+00> : vector<2x128xf32>
    %31 = tpu.matmul %28, %30, %cst_18 {dimension_numbers = #tpu.dot_dimension_numbers<[1], [0], [0], [1], [0, 0, 1, 1], [], []>} : vector<2x24xbf16>, vector<24x128xbf16>, vector<2x128xf32> -> vector<2x128xf32>
    %32 = arith.addf %26, %31 : vector<2x128xf32>
    %33 = vector.extract_strided_slice %7 {offsets = [0, 4, 0], sizes = [2, 1, 24], strides = [1, 1, 1]} : vector<2x8x24xbf16> to vector<2x1x24xbf16>
    %34 = vector.shape_cast %33 : vector<2x1x24xbf16> to vector<2x24xbf16>
    %c4 = arith.constant 4 : index
    %c0_19 = arith.constant 0 : index
    %c0_20 = arith.constant 0 : index
    %35 = vector.load %arg3[%c4, %c0_19, %c0_20] : memref<8x24x128xbf16, #tpu.memory_space<vmem>>, vector<1x24x128xbf16>
    %36 = vector.shape_cast %35 : vector<1x24x128xbf16> to vector<24x128xbf16>
    %cst_21 = arith.constant dense<0.000000e+00> : vector<2x128xf32>
    %37 = tpu.matmul %34, %36, %cst_21 {dimension_numbers = #tpu.dot_dimension_numbers<[1], [0], [0], [1], [0, 0, 1, 1], [], []>} : vector<2x24xbf16>, vector<24x128xbf16>, vector<2x128xf32> -> vector<2x128xf32>
    %38 = arith.addf %32, %37 : vector<2x128xf32>
    %39 = vector.extract_strided_slice %7 {offsets = [0, 5, 0], sizes = [2, 1, 24], strides = [1, 1, 1]} : vector<2x8x24xbf16> to vector<2x1x24xbf16>
    %40 = vector.shape_cast %39 : vector<2x1x24xbf16> to vector<2x24xbf16>
    %c5 = arith.constant 5 : index
    %c0_22 = arith.constant 0 : index
    %c0_23 = arith.constant 0 : index
    %41 = vector.load %arg3[%c5, %c0_22, %c0_23] : memref<8x24x128xbf16, #tpu.memory_space<vmem>>, vector<1x24x128xbf16>
    %42 = vector.shape_cast %41 : vector<1x24x128xbf16> to vector<24x128xbf16>
    %cst_24 = arith.constant dense<0.000000e+00> : vector<2x128xf32>
    %43 = tpu.matmul %40, %42, %cst_24 {dimension_numbers = #tpu.dot_dimension_numbers<[1], [0], [0], [1], [0, 0, 1, 1], [], []>} : vector<2x24xbf16>, vector<24x128xbf16>, vector<2x128xf32> -> vector<2x128xf32>
    %44 = arith.addf %38, %43 : vector<2x128xf32>
    %45 = vector.extract_strided_slice %7 {offsets = [0, 6, 0], sizes = [2, 1, 24], strides = [1, 1, 1]} : vector<2x8x24xbf16> to vector<2x1x24xbf16>
    %46 = vector.shape_cast %45 : vector<2x1x24xbf16> to vector<2x24xbf16>
    %c6 = arith.constant 6 : index
    %c0_25 = arith.constant 0 : index
    %c0_26 = arith.constant 0 : index
    %47 = vector.load %arg3[%c6, %c0_25, %c0_26] : memref<8x24x128xbf16, #tpu.memory_space<vmem>>, vector<1x24x128xbf16>
    %48 = vector.shape_cast %47 : vector<1x24x128xbf16> to vector<24x128xbf16>
    %cst_27 = arith.constant dense<0.000000e+00> : vector<2x128xf32>
    %49 = tpu.matmul %46, %48, %cst_27 {dimension_numbers = #tpu.dot_dimension_numbers<[1], [0], [0], [1], [0, 0, 1, 1], [], []>} : vector<2x24xbf16>, vector<24x128xbf16>, vector<2x128xf32> -> vector<2x128xf32>
    %50 = arith.addf %44, %49 : vector<2x128xf32>
    %51 = vector.extract_strided_slice %7 {offsets = [0, 7, 0], sizes = [2, 1, 24], strides = [1, 1, 1]} : vector<2x8x24xbf16> to vector<2x1x24xbf16>
    %52 = vector.shape_cast %51 : vector<2x1x24xbf16> to vector<2x24xbf16>
    %c7 = arith.constant 7 : index
    %c0_28 = arith.constant 0 : index
    %c0_29 = arith.constant 0 : index
    %53 = vector.load %arg3[%c7, %c0_28, %c0_29] : memref<8x24x128xbf16, #tpu.memory_space<vmem>>, vector<1x24x128xbf16>
    %54 = vector.shape_cast %53 : vector<1x24x128xbf16> to vector<24x128xbf16>
    %cst_30 = arith.constant dense<0.000000e+00> : vector<2x128xf32>
    %55 = tpu.matmul %52, %54, %cst_30 {dimension_numbers = #tpu.dot_dimension_numbers<[1], [0], [0], [1], [0, 0, 1, 1], [], []>} : vector<2x24xbf16>, vector<24x128xbf16>, vector<2x128xf32> -> vector<2x128xf32>
    %56 = arith.addf %50, %55 : vector<2x128xf32>
    %57 = vector.broadcast %0 : vector<1x128xf32> to vector<2x128xf32>
    %58 = arith.addf %56, %57 : vector<2x128xf32>
    %c0_31 = arith.constant 0 : index
    %c0_32 = arith.constant 0 : index
    %c0_33 = arith.constant 0 : index
    %c0_34 = arith.constant 0 : index
    %59 = vector.load %arg5[%c0_31, %c0_32, %c0_33, %c0_34] : memref<1x1x2x128xf32, #tpu.memory_space<vmem>>, vector<1x1x2x128xf32>
    %60 = vector.shape_cast %59 : vector<1x1x2x128xf32> to vector<2x128xf32>
    %61 = vector.shape_cast %58 : vector<2x128xf32> to vector<1x1x2x128xf32>
    tpu.vector_store %arg5[%c0_31, %c0_32, %c0_33, %c0_34], %61 {strides = array<i32>} : memref<1x1x2x128xf32, #tpu.memory_space<vmem>>, vector<1x1x2x128xf32>,
    return
  }
  func.func @transform_0(%arg0: i32, %arg1: i32) -> (i32, i32, i32, i32, i32) {
    %c0_i32 = arith.constant 0 : i32
    %c0_i32_0 = arith.constant 0 : i32
    %c0_i32_1 = arith.constant 0 : i32
    %c0_i32_2 = arith.constant 0 : i32
    return %arg0, %c0_i32, %arg1, %c0_i32_0, %c0_i32_1 : i32, i32, i32, i32, i32
  }
  func.func @transform_1(%arg0: i32, %arg1: i32) -> (i32, i32, i32) {
    %c0_i32 = arith.constant 0 : i32
    %c0_i32_0 = arith.constant 0 : i32
    %c0_i32_1 = arith.constant 0 : i32
    %c0_i32_2 = arith.constant 0 : i32
    return %c0_i32, %c0_i32_0, %c0_i32_1 : i32, i32, i32
  }
  func.func @transform_2(%arg0: i32, %arg1: i32) -> (i32, i32) {
    %c0_i32 = arith.constant 0 : i32
    %c0_i32_0 = arith.constant 0 : i32
    %c0_i32_1 = arith.constant 0 : i32
    return %c0_i32, %c0_i32_0 : i32, i32
  }
  func.func @transform_3(%arg0: i32, %arg1: i32) -> (i32, i32, i32, i32) {
    %c0_i32 = arith.constant 0 : i32
    %c0_i32_0 = arith.constant 0 : i32
    %c0_i32_1 = arith.constant 0 : i32
    return %arg0, %arg1, %c0_i32, %c0_i32_0 : i32, i32, i32, i32
  }
}

</mosaic_0001>

<bundles_post_ra>
// kernel: patch_embedding.1
= control target key start
LH: loop header
LB: loop body
LE: loop exit
PB: predicated region body
PF: predicated region fallthrough
CT: control target
= control target key end

     0   :  { %s1238_s0 = inlined_call_operand.hbm [shape: f32[2,3,2,8,16], index: 0, kind: input, shape index: {}]   ;;  %s1239_s1 = inlined_call_operand.hbm [shape: bf16[8,24,128], index: 1, kind: input, shape index: {}]   ;;  %s1240_s2 = inlined_call_operand.vmem [shape: f32[1,128], index: 2, kind: input, shape index: {}]   ;;  %s1241_s3 = inlined_call_operand.hbm [shape: f32[2,2,2,128], index: 3, kind: output, shape index: {}]  }
   0x1   :  { %1248 = sst [smem:[#allocation16_spill]] %s1239_s1 }
   0x2   :  { %8 = vsyncpa [#allocation3], 0 }
   0x3   :  { %10 = vsyncpa [#allocation3 + $0x1], 0 }
   0x4   :  { %11 = vsyncpa [#allocation6], 0 }
   0x5   :  { %12 = vsyncpa [#allocation4], 0 }
   0x6   :  { %14 = vsyncpa [#allocation4 + $0x1], 0  ;;  %s1037_s12 = smov 0   ;;  %s1039_s13 = smov 0  }
   0x7   :  { %s1041_s14 = smov 0   ;;  %s1043_s15 = smov 0  }
   0x8   :  { %s1045_s16 = smov 0   ;;  %s1047_s17 = smov 0  }
   0x9   :  { %s1049_s18 = smov 0   ;;  %s1051_s19 = smov 0  }
   0xa LB: > { %1249 = sst [smem:[#allocation11_spill]] %s981_s12  ;;  %s684_s20 = sadd.s32 4294967295, %s1009_s19   ;;  %s1009_s19 = sphi %s1051_s19, %s20_s19   ;;  %s1005_s18 = sphi %s1049_s18, %s1273_s18   ;;  %s1001_s17 = sphi %s1047_s17, %s1272_s17   ;;  %s997_s16 = sphi %s1045_s16, %s1271_s16   ;;  %s993_s15 = sphi %s1043_s15, %s1270_s15   ;;  %s989_s14 = sphi %s1041_s14, %s1269_s14   ;;  %s985_s13 = sphi %s1039_s13, %s1268_s13   ;;  %s981_s12 = sphi %s1037_s12, %s1267_s12  }
   0xb   : > { %s685_s21 = sadd.s32 4294967294, %s1009_s19   ;;  %p54_p0 = scmp.ne.s32.totalorder %s985_s13, %s981_s12 }
   0xc   : > { %p1081_p1 = scmp.eq.s32.totalorder %s684_s20, 0  ;;  %p1085_p2 = scmp.eq.s32.totalorder %s684_s20, 3 }
   0xd   : > { %p128_p3 = scmp.eq.s32.totalorder %s685_s21, 3  ;;  %p686_p5 = scmp.ge.s32.totalorder %s1009_s19, 1 }
   0xe   : > { %p1091_p4 = por %p1081_p1, %p54_p0  ;;  %p135_p7 = scmp.lt.s32.totalorder %s1009_s19, 5 }
   0xf   : > { %p1096_p6 = por %p128_p3, %p54_p0  ;;  %s1255_s1 = sld [smem:[#allocation16_spill]] }
  0x10   : > { %p1104_p8 = pnand %p686_p5, %p135_p7  ;;  %s1011_s30 = smov [#allocation5]  }
  0x11   : > { %s1253_s25 = scalar_select %p1096_p6, 1, 0 }
  0x12   : > { %p759_p9 = pneg %p1104_p8  ;;  %s148_s4 = sshll.u32 %s1011_s30, 4  ;;  %s149_s4 = int_to_ptr.vmem [resolvable:$true] %s148_s4 }
  0x13   : > { %1254 = sst [smem:[#allocation12_spill]] %s1253_s25  ;;  %s1012_s5 = smov 64  }
  0x14   : > { %p760_p10 = pnand %p759_p9, %p1081_p1  ;;  %s1013_s6 = smov 4  }
  0x15   : > { %s146_s28 = sshll.u32 %s1255_s1, 4  ;;  %s29_s7 = sadd.s32 1, %s1001_s17  ;;  %s147_s28 = int_to_ptr.hbm [resolvable:$true] %s146_s28 }
  0x16   : > { %762 = dma.hbm_to_vmem [thread:$0]  (!%p760_p10), %s147_s28, 1536, %s149_s4, [#allocation6], %s1012_s5, %s1012_s5, %s1013_s6  }
  0x17   : > { %p30_p11 = scmp.ge.s32.totalorder %s29_s7, 2  ;;  %s32_s8 = sadd.s32 1, %s1005_s18 }
  0x18   : > { %s41_s9 = sadd.s32 1, %s989_s14  ;;  %p48_p12 = scmp.ne.s32.totalorder %s989_s14, %s985_s13 }
  0x19   : > { %s1275_s7 = smov (%p30_p11, %s29_s7), 0  ;;  %s1277_s8 = smov (!%p30_p11, %s32_s8), %s1005_s18 }
  0x1a   : > { %1257 = sst [smem:[#allocation13_spill]] %s1275_s7  ;;  %s37_s10 = ssub.s32 %s1001_s17, %s1275_s7 }
  0x1b   : > { %p49_p13 = scmp.eq.s32.totalorder %s1009_s19, 0  ;;  %p34_p0 = scmp.ge.s32.totalorder %s1277_s8, 2 }
  0x1c   : > { %p1125_p3 = por %p1085_p2, %p48_p12  ;;  %p772_p7 = scmp.lt.s32.totalorder %s1009_s19, 4 }
  0x1d   : > { %p1129_p5 = por %p49_p13, %p48_p12  ;;  %s1279_s8 = smov (%p34_p0, %s1277_s8), 0 }
  0x1e   : > { %s1258_s11 = scalar_select %p1125_p3, 1, 0 }
  0x1f   : > { %1261 = sst [smem:[#allocation15_spill]] %s1279_s8  ;;  %s165_s21 = sand.u32 1, %s989_s14  }
  0x20   : > { %1259 = sst [smem:[#allocation14_spill]] %s1258_s11  ;;  %s749_s26 = smul.u32 6, %s1005_s18 }
  0x21   : > { %s36_s27 = ssub.s32 %s1005_s18, %s1279_s8  ;;  %s748_s30 = smul.u32 24, %s165_s21 }
  0x22   : > { %s38_s28 = sor.u32 %s37_s10, %s36_s27  ;;  %s173_s23 = sadd.s32 %s1001_s17, %s749_s26 }
  0x23   : > { %p39_p9 = scmp.eq.s32.totalorder %s38_s28, 0  ;;  %s689_s4 = sshll.u32 %s173_s23, 3 }
  0x24   : > { %s175_s7 = scalar_lea.hbm %s1238_s0, %s689_s4  ;;  %s169_s25 = scalar_lea.vmem [#allocation2], %s748_s30 }
  0x25   : > { %s1142_s5 = scalar_select %p39_p9, %s989_s14, %s41_s9  }
  0x26   : > { %s178_s12 = sshll.u32 %s169_s25, 4  ;;  %s176_s11 = sshll.u32 %s175_s7, 4  ;;  %s179_s12 = int_to_ptr.vmem [resolvable:$true] %s178_s12  ;;  %s177_s11 = int_to_ptr.hbm [resolvable:$true] %s176_s11 }
  0x27   : > { %p764_p2 = pnand %p772_p7, %p1129_p5  ;;  %s166_s8 = scalar_lea.sflag [#allocation3], %s165_s21 }
  0x28   : > { %s1014_s10 = smov 256   ;;  %s1015_s27 = smov 128  }
  0x29   : > { %s1016_s28 = smov 8   ;;  %190 = sbr.rel (%p1104_p8) target bundleno = 393 (0x189), region = 32 }
  0x2a   : > { %766 = dma.hbm_to_vmem [thread:$0]  (!%p764_p2), %s177_s11, 384, %s179_s12, %s166_s8, %s1014_s10, %s1015_s27, %s1016_s28  }
  0x2b   : > { %s1154_s1 = sand.u32 (!%p1104_p8), 1, %s985_s13  }
  0x2c   : > { %s750_s25 = smul.u32 (!%p1104_p8), 24, %s1154_s1  ;;  %s193_s7 = scalar_lea.sflag (!%p1104_p8), [#allocation3], %s1154_s1 }
  0x2e   : > { %s196_s9 = scalar_lea.vmem [#allocation2], %s750_s25 }
  0x2f   : > { %968 = dma.done.wait (%p1091_p4), %s193_s7, 384  }
  0x30   : > { %970 = vsyncadd (%p1091_p4), %s193_s7, 4294966912 }
  0x31   : > { %972 = dma.done.wait (%p1081_p1), [#allocation6], 1536  }
  0x32   : > { %974 = vsyncadd (%p1081_p1), [#allocation6], 4294965760  ;;  %v227_v0 = vld [vmem:[%s196_s9] sm:$0xff]  ;;  %v228_v1 = vld [vmem:[%s196_s9 + $0x8] sm:$0xff]  ;;  %vm296_vm0 = vcmask 1043456   ;;  %vm280_vm1 = vcmask 1041409  }
  0x33   : > { %230 = vxpose.xlu0.b32.start [1/3] (short) (narrow) %v227_v0, 16  ;;  %v229_v2 = vld [vmem:[%s196_s9 + $0x10] sm:$0xff]  ;;  %v270_v3 = vld [vmem:[#allocation5 + $0x14] sm:$0xf]  ;;  %v266_v5 = vld [vmem:[#allocation5 + $0x8] sm:$0xf] }
  0x34   : > { %v288_v4 = vunpack.c.l.b16 %v270_v3  ;;  %v347_v6 = vld [vmem:[#allocation5 + $0x20] sm:$0xf]  ;;  %v384_v7 = vld [vmem:[#allocation5 + $0x2c] sm:$0xf]  ;;  %v321_v9 = vunpack.c.l.b16 %v266_v5  ;;  %v742_v21 = vld [vmem:[#allocation5 + $0x18] sm:$0xff]  ;;  %vm292_vm2 = vcmask 195584  }
  0x35   : > { %v357_v10 = vunpack.c.l.b16 %v347_v6  ;;  %v394_v11 = vunpack.c.l.b16 %v384_v7  ;;  %v741_v19 = vld [vmem:[#allocation5 + $0xc] sm:$0xff]  ;;  %v740_v20 = vld [vmem:[#allocation5] sm:$0xff]  ;;  %v532_v24 = vld [vmem:[#allocation5 + $0x5c] sm:$0xf]  ;;  %s736_s12 = sshll.u32 %s997_s16, 1  ;;  %s692_s24 = sshll.u32 %s1154_s1, 1 }
  0x36   : > { %v290_v8 = vpack.c.b16 %v288_v4, %v288_v4  ;;  %v323_v13 = vpack.c.b16 %v321_v9, %v321_v9  ;;  %v743_v22 = vld [vmem:[#allocation5 + $0x24] sm:$0xff]  ;;  %v495_v23 = vld [vmem:[#allocation5 + $0x50] sm:$0xf]  ;;  %v421_v25 = vld [vmem:[#allocation5 + $0x38] sm:$0xf]  ;;  %v542_v27 = vunpack.c.l.b16 %v532_v24  ;;  %s582_s22 = sadd.s32 %s993_s15, %s736_s12  ;;  %s224_s15 = scalar_lea.vmem [#allocation7], %s692_s24 }
  0x37   : > { %v359_v14 = vpack.c.b16 %v357_v10, %v357_v10  ;;  %v396_v15 = vpack.c.b16 %v394_v11, %v394_v11  ;;  %v505_v26 = vunpack.c.l.b16 %v495_v23  ;;  %v431_v28 = vunpack.c.l.b16 %v421_v25  ;;  %v458_v29 = vld [vmem:[#allocation5 + $0x44] sm:$0xf]  ;;  %v746_v39 = vld [vmem:[#allocation5 + $0x48] sm:$0xff]  ;;  %v747_v40 = vld [vmem:[#allocation5 + $0x54] sm:$0xff]  ;;  %s737_s29 = sshll.u32 %s582_s22, 1  ;;  %s586_s30 = sshll.u32 %s224_s15, 4  ;;  %s587_s30 = int_to_ptr.vmem [resolvable:$true] %s586_s30 }
  0x38   : > { %v298_v12 = vsel %vm296_vm0, %v290_v8, 0  ;;  %v329_v16 = vsel %vm296_vm0, %v323_v13, 0  ;;  %v468_v30 = vunpack.c.l.b16 %v458_v29  ;;  %v544_v32 = vpack.c.b16 %v542_v27, %v542_v27  ;;  %v744_v41 = vld [vmem:[#allocation5 + $0x30] sm:$0xff]  ;;  %v745_v42 = vld [vmem:[#allocation5 + $0x3c] sm:$0xff]  ;;  %s584_s20 = scalar_lea.hbm %s1241_s3, %s737_s29  ;;  %s572_s4 = scalar_lea.sflag [#allocation4], %s1154_s1 }
  0x39   : > { %306 = vmatpush.bf16.msra.mxu0 %v298_v12  ;;  %v365_v17 = vsel %vm296_vm0, %v359_v14, 0  ;;  %v402_v18 = vsel %vm296_vm0, %v396_v15, 0  ;;  %337 = vmatpush.bf16.msra.mxu1 %v329_v16  ;;  %v507_v31 = vpack.c.b16 %v505_v26, %v505_v26  ;;  %v433_v33 = vpack.c.b16 %v431_v28, %v431_v28  ;;  %s588_s23 = sshll.u32 %s584_s20, 4  ;;  %s927_s25 = scalar_lea.hbm %s1241_s3, 8  ;;  %s589_s23 = int_to_ptr.hbm [resolvable:$true] %s588_s23 }
  0x3a   : > { %373 = vmatpush.bf16.msra.mxu2 %v365_v17  ;;  %410 = vmatpush.bf16.msra.mxu3 %v402_v18  ;;  %v470_v34 = vpack.c.b16 %v468_v30, %v468_v30  ;;  %v550_v36 = vsel %vm296_vm0, %v544_v32, 0  ;;  %s921_s6 = sshra.s32 %s589_s23, 4  ;;  %s922_s6 = int_to_ptr.hbm [resolvable:$true] %s921_s6 }
  0x3b   : > { %231 = vxpose.xlu0.b32.cont [2/3] (short) (narrow) %v228_v1, 16  ;;  %v513_v35 = vsel %vm296_vm0, %v507_v31, 0  ;;  %v439_v37 = vsel %vm296_vm0, %v433_v33, 0  ;;  %s923_s10 = scalar_lea.hbm %s922_s6, 2  ;;  %p928_p10 = scmp.lt.s32.totalorder %s922_s6, %s1241_s3 }
  0x3c   : > { %v476_v38 = vsel %vm296_vm0, %v470_v34, 0  ;;  %p924_p1 = scmp.ne.s32.totalorder %s922_s6, %s923_s10  ;;  %p929_p11 = scmp.lt.s32.totalorder %s927_s25, %s923_s10 }
  0x3d   : > { %307 = vmatpush.bf16.msra.mxu0 %v741_v19  ;;  %338 = vmatpush.bf16.msra.mxu1 %v740_v20 }
  0x3e   : > { %374 = vmatpush.bf16.msra.mxu2 %v742_v21  ;;  %411 = vmatpush.bf16.msra.mxu3 %v743_v22  ;;  %p925_p4 = pnand %p924_p1, %p1125_p3  ;;  %p930_p12 = por %p929_p11, %p928_p10 }
  0x40   : > { %p926_p8 = pneg %p925_p4 }
  0x41   : > { %447 = vmatpush.bf16.msrb.mxu0 %v439_v37  ;;  %484 = vmatpush.bf16.msrb.mxu1 %v476_v38 }
  0x42   : > { %521 = vmatpush.bf16.msrb.mxu2 %v513_v35  ;;  %558 = vmatpush.bf16.msrb.mxu3 %v550_v36  ;;  %v846_v36 = vld [vmem:[%s1240_s2] ss:$0 sm:$0xff]  ;;  %p931_p13 = pnand %p930_p12, %p926_p8 }
  0x43   : > { %232 = vxpose.xlu0.b32.end [3/3] (short) (narrow) %v229_v2, 16 }
  0x45   : > { %448 = vmatpush.bf16.msrb.mxu0 %v744_v41  ;;  %485 = vmatpush.bf16.msrb.mxu1 %v745_v42 }
  0x46   : > { %522 = vmatpush.bf16.msrb.mxu2 %v746_v39  ;;  %559 = vmatpush.bf16.msrb.mxu3 %v747_v40 }
  0xd7   : > { %v246_v43 = vpop.trf.xlu0 }
  0xd8   : > { %v262_v44 = vpack.c.bf16 %v246_v43, %v246_v43 }
  0xda   : > { %v273_v45 = vunpack.c.l.b16 %v262_v44 }
  0xdc   : > { %v693_v47 = vunpack.i.l.s16 %v273_v45 }
  0xde   : > { %v279_v51 = vrot.slane %v693_v47, 1  ;;  %v348_v52 = vrot.slane %v693_v47, 2  ;;  %v385_v53 = vrot.slane %v693_v47, 3  ;;  %v422_v2 = vrot.slane %v693_v47, 4 }
  0xdf   : > { %v247_v46 = vpop.trf.xlu0  ;;  %v459_v7 = vrot.slane %v693_v47, 5  ;;  %v496_v8 = vrot.slane %v693_v47, 6  ;;  %v533_v9 = vrot.slane %v693_v47, 7 }
  0xe0   : > { %v263_v48 = vpack.c.bf16 %v247_v46, %v247_v46 }
  0xe2   : > { %v274_v49 = vunpack.c.l.b16 %v263_v48 }
  0xe4   : > { %v694_v50 = vunpack.i.l.s16 %v274_v49 }
  0xe6   : > { %v281_v54 = vsel %vm280_vm1, %v694_v50, %v279_v51  ;;  %v313_v55 = vrot.slane %v694_v50, 7  ;;  %v349_v56 = vrot.slane %v694_v50, 1  ;;  %v386_v57 = vrot.slane %v694_v50, 2 }
  0xe7   : > { %v282_v58 = vpack.c.b16 %v281_v54, %v281_v54  ;;  %v423_v1 = vrot.slane %v694_v50, 3  ;;  %v460_v3 = vrot.slane %v694_v50, 4  ;;  %v497_v4 = vrot.slane %v694_v50, 5 }
  0xe8   : > { %v314_v59 = vsel %vm280_vm1, %v313_v55, %v693_v47  ;;  %v350_v60 = vsel %vm280_vm1, %v349_v56, %v348_v52  ;;  %v387_v61 = vsel %vm280_vm1, %v386_v57, %v385_v53  ;;  %v534_v5 = vrot.slane %v694_v50, 6 }
  0xe9   : > { %699 = vmatmul.msk.bf16.vlgmr.msra.gmra.mxu0 %vm292_vm2, %v282_v58  ;;  %v315_v62 = vpack.c.b16 %v314_v59, %v314_v59  ;;  %v351_v63 = vpack.c.b16 %v350_v60, %v350_v60  ;;  %v388_v0 = vpack.c.b16 %v387_v61, %v387_v61  ;;  %v424_v6 = vsel %vm280_vm1, %v423_v1, %v422_v2 }
  0xea   : > { %v461_v10 = vsel %vm280_vm1, %v460_v3, %v459_v7  ;;  %v498_v11 = vsel %vm280_vm1, %v497_v4, %v496_v8  ;;  %v425_v12 = vpack.c.b16 %v424_v6, %v424_v6  ;;  %v535_v13 = vsel %vm280_vm1, %v534_v5, %v533_v9 }
  0xeb   : > { %704 = vmatmul.msk.bf16.vlgmr.msra.gmra.mxu1 %vm292_vm2, %v315_v62  ;;  %709 = vmatmul.msk.bf16.vlgmr.msra.gmra.mxu2 %vm292_vm2, %v351_v63  ;;  %v462_v14 = vpack.c.b16 %v461_v10, %v461_v10  ;;  %v499_v15 = vpack.c.b16 %v498_v11, %v498_v11  ;;  %v536_v16 = vpack.c.b16 %v535_v13, %v535_v13 }
  0xec   : > { %714 = vmatmul.msk.bf16.vlgmr.msra.gmra.mxu3 %vm292_vm2, %v388_v0 }
  0xf9   : > { %719 = vmatmul.msk.bf16.vlgmr.msrb.gmra.mxu0 %vm292_vm2, %v425_v12 }
  0xfb   : > { %724 = vmatmul.msk.bf16.vlgmr.msrb.gmra.mxu1 %vm292_vm2, %v462_v14  ;;  %729 = vmatmul.msk.bf16.vlgmr.msrb.gmra.mxu2 %vm292_vm2, %v499_v15 }
  0xfc   : > { %734 = vmatmul.msk.bf16.vlgmr.msrb.gmra.mxu3 %vm292_vm2, %v536_v16 }
 0x166   : > { %v309_v17 = vpop.f32.mrf.mxu0 }
 0x168   : > { %v340_v18 = vpop.f32.mrf.mxu1 }
 0x169   : > { %v341_v23 = vadd.f32 %v340_v18, %v309_v17 }
 0x16e   : > { %v311_v19 = vpop.f32.mrf.mxu0  ;;  %v376_v20 = vpop.f32.mrf.mxu2 }
 0x16f   : > { %v413_v21 = vpop.f32.mrf.mxu3  ;;  %v380_v24 = vadd.f32 %v376_v20, %v341_v23 }
 0x170   : > { %v342_v22 = vpop.f32.mrf.mxu1 }
 0x171   : > { %v417_v27 = vadd.f32 %v413_v21, %v380_v24 }
 0x176   : > { %v378_v25 = vpop.f32.mrf.mxu2  ;;  %v450_v26 = vpop.f32.mrf.mxu0 }
 0x177   : > { %v415_v28 = vpop.f32.mrf.mxu3  ;;  %v454_v30 = vadd.f32 %v450_v26, %v417_v27 }
 0x178   : > { %v487_v29 = vpop.f32.mrf.mxu1 }
 0x179   : > { %v491_v31 = vadd.f32 %v487_v29, %v454_v30 }
 0x17e   : > { %v452_v32 = vpop.f32.mrf.mxu0  ;;  %v524_v33 = vpop.f32.mrf.mxu2 }
 0x17f   : > { %v528_v34 = vadd.f32 %v524_v33, %v491_v31  ;;  %v561_v35 = vpop.f32.mrf.mxu3 }
 0x180   : > { %v489_v37 = vpop.f32.mrf.mxu1 }
 0x181   : > { %v565_v38 = vadd.f32 %v561_v35, %v528_v34 }
 0x183   : > { %v569_v39 = vadd.f32 %v846_v36, %v565_v38 }
 0x185   : > { %570 = vst [vmem:[%s224_s15] sm:$0x3] %v569_v39 }
 0x186   : > { %v526_v40 = vpop.f32.mrf.mxu2 }
 0x187   : > { %934 = shalt.err (!%p931_p13)
}
 0x188   : > { %757 = dma.vmem_to_hbm [thread:$0]  (%p1125_p3), %s587_s30, 32, %s589_s23, %s572_s4   ;;  %v563_v41 = vpop.f32.mrf.mxu3 }
 0x189 PF: > { %s1263_s1 = sld [smem:[#allocation11_spill]]  ;;  %p774_p0 = scmp.ge.s32.totalorder %s1009_s19, 2 }
 0x18b   : > { %p768_p5 = pnand %p774_p0, %p1096_p6 }
 0x18d   : > { %p769_p7 = pneg %p768_p5 }
 0x18f   : > { %s600_s22 = sand.u32 1, %s1263_s1  }
 0x190   : > { %s601_s24 = scalar_lea.sflag [#allocation4], %s600_s22 }
 0x191   : > { %976 = dma.done.wait (%p769_p7), %s601_s24, 32  }
 0x192   : > { %978 = vsyncadd (%p769_p7), %s601_s24, 4294967264  ;;  %s20_s19 = sadd.s32 1, %s1009_s19   ;;  %s1265_s29 = sld [smem:[#allocation13_spill]] }
 0x193   : > { %p17_p9 = scmp.ge.s32.totalorder %s20_s19, 6   ;;  %s1266_s8 = sld [smem:[#allocation15_spill]] }
 0x194   : > { %s1267_s12 = smov %s985_s13  ;;  %s1268_s13 = smov %s989_s14 }
 0x195   : > { %s1269_s14 = smov %s1142_s5  ;;  %s1270_s15 = smov %s1001_s17 }
 0x196   : > { %s1271_s16 = smov %s1005_s18  ;;  %19 = sbr.rel (!%p17_p9) target bundleno = 10 (0xa), region = 88 }
 0x198   : > { %s1272_s17 = smov %s1265_s29 }
 0x199   : > { %s1273_s18 = smov %s1266_s8 }
 0x19b   :  { %607 = vsyncpa [#allocation3], 1 }
 0x19c   :  { %609 = vsyncpa [#allocation3 + $0x1], 1 }
 0x19d   :  { %610 = vsyncpa [#allocation6], 1 }
 0x19e   :  { %611 = vsyncpa [#allocation4], 1 }
 0x19f   :  { %613 = vsyncpa [#allocation4 + $0x1], 1 }

</bundles_post_ra>
